<compile_context>
chip_gen: v7x
topology: tpu7x:2x2x1
jax: 0.10.0
libtpu: 0.0.40
codegen_flags: <defaults>
</compile_context>

<pallas_src>
import functools

import jax
import jax.numpy as jnp
from jax.experimental import pallas as pl
from jax.experimental.pallas import tpu as pltpu


# ---------------------------------------------------------------------------
# helpers
# ---------------------------------------------------------------------------
def _round_up(x, m):
    return (x + m - 1) // m * m


def _pick_tile(d, cap, granule):
    """Pad d up to `granule`, pick a tile <= cap (multiple of granule) dividing it."""
    dp = _round_up(d, granule)
    if dp <= cap:
        return dp, dp
    t = cap
    while dp % t:
        t -= granule
    return dp, t


# ---------------------------------------------------------------------------
# Fused matmul kernel:  out = act(A @ B + bias [+ residual])
# ---------------------------------------------------------------------------
def _mm_fused_kernel(a_ref, b_ref, bias_ref, *rest, relu, has_res):
    if has_res:
        res_ref, o_ref, acc_ref = rest
    else:
        res_ref = None
        o_ref, acc_ref = rest

    k = pl.program_id(2)

    @pl.when(k == 0)
    def _init():
        acc_ref[...] = jnp.zeros_like(acc_ref)

    acc_ref[...] += jnp.dot(a_ref[...], b_ref[...],
                            preferred_element_type=jnp.float32)

    @pl.when(k == pl.num_programs(2) - 1)
    def _finish():
        out = acc_ref[...] + bias_ref[...]
        if has_res:
            out = out + res_ref[...]
        if relu:
            out = jnp.maximum(out, 0.0)
        o_ref[...] = out.astype(o_ref.dtype)


def matmul_fused(a, b, bias, residual=None, relu=False):
    """act(a @ b + bias [+ residual]); a:(M,K) b:(K,N) bias:(N,) residual:(M,N)."""
    M, K = a.shape
    K2, N = b.shape
    assert K == K2

    # Tile plan: modest caps that fit comfortably on all generations
    # (v7x has only 64 MiB VMEM; these tiles use < 3 MiB incl. double buffers).
    Mp, tm = _pick_tile(M, 256, 8)
    Np, tn = _pick_tile(N, 256, 128)
    Kp, tk = _pick_tile(K, 512, 128)

    # bf16 MXU inputs, f32 accumulation / epilogue.
    a_p = jnp.pad(a, ((0, Mp - M), (0, Kp - K))).astype(jnp.bfloat16)
    b_p = jnp.pad(b, ((0, Kp - K), (0, Np - N))).astype(jnp.bfloat16)
    bias_p = jnp.pad(bias.astype(jnp.float32).reshape(1, N), ((0, 0), (0, Np - N)))

    in_specs = [
        pl.BlockSpec((tm, tk), lambda i, j, k: (i, k)),
        pl.BlockSpec((tk, tn), lambda i, j, k: (k, j)),
        pl.BlockSpec((1, tn), lambda i, j, k: (0, j)),
    ]
    args = [a_p, b_p, bias_p]

    has_res = residual is not None
    if has_res:
        res_p = jnp.pad(residual.astype(jnp.float32), ((0, Mp - M), (0, Np - N)))
        in_specs.append(pl.BlockSpec((tm, tn), lambda i, j, k: (i, j)))
        args.append(res_p)

    out = pl.pallas_call(
        functools.partial(_mm_fused_kernel, relu=relu, has_res=has_res),
        out_shape=jax.ShapeDtypeStruct((Mp, Np), jnp.float32),
        grid=(Mp // tm, Np // tn, Kp // tk),
        in_specs=in_specs,
        out_specs=pl.BlockSpec((tm, tn), lambda i, j, k: (i, j)),
        scratch_shapes=[pltpu.VMEM((tm, tn), jnp.float32)],
        compiler_params=pltpu.CompilerParams(
            dimension_semantics=("parallel", "parallel", "arbitrary")),
    )(*args)
    return out[:M, :N]


# ---------------------------------------------------------------------------
# Fused BatchNorm-affine + ReLU + 3x3/stride-2 max-pool kernel
# ---------------------------------------------------------------------------
def _bn_relu_maxpool_kernel(*refs):
    taps = refs[:9]
    s_ref, t_ref, o_ref = refs[9], refs[10], refs[11]
    s = s_ref[...]
    t = t_ref[...]
    m = taps[0][...] * s + t
    for r in taps[1:]:
        m = jnp.maximum(m, r[...] * s + t)
    o_ref[...] = jnp.maximum(m, 0.0)


def bn_relu_maxpool_3x3_s2(x, scale, shift):
    """relu(x*scale+shift) followed by 3x3/stride-2 max-pool; x: NHWC."""
    N, H, W, C = x.shape
    Ho = (H - 3) // 2 + 1
    Wo = (W - 3) // 2 + 1
    M = N * Ho * Wo

    # 9 shifted window taps (layout plumbing); running max happens in-kernel.
    taps = []
    for i in range(3):
        for j in range(3):
            taps.append(
                x[:, i:i + 2 * (Ho - 1) + 1:2,
                     j:j + 2 * (Wo - 1) + 1:2, :].reshape(M, C))

    s2 = scale.astype(jnp.float32).reshape(1, C)
    t2 = shift.astype(jnp.float32).reshape(1, C)

    # Lane-densify: fold channels up to 128 lanes (e.g. C=64 -> (M/2, 128)).
    if C < 128 and 128 % C == 0 and M % (128 // C) == 0:
        fold = 128 // C
        Md, Cd = M // fold, C * fold
        taps = [tp.reshape(Md, Cd) for tp in taps]
        s2 = jnp.tile(s2, (1, fold))
        t2 = jnp.tile(t2, (1, fold))
    else:
        Md, Cd = M, C

    Mp, tm = _pick_tile(Md, 512, 8)
    taps = [jnp.pad(tp, ((0, Mp - Md), (0, 0))) for tp in taps]

    tap_spec = pl.BlockSpec((tm, Cd), lambda i: (i, 0))
    vec_spec = pl.BlockSpec((1, Cd), lambda i: (0, 0))

    out = pl.pallas_call(
        _bn_relu_maxpool_kernel,
        out_shape=jax.ShapeDtypeStruct((Mp, Cd), jnp.float32),
        grid=(Mp // tm,),
        in_specs=[tap_spec] * 9 + [vec_spec, vec_spec],
        out_specs=pl.BlockSpec((tm, Cd), lambda i: (i, 0)),
        compiler_params=pltpu.CompilerParams(dimension_semantics=("parallel",)),
    )(*taps, s2, t2)

    return out[:Md].reshape(M, C).reshape(N, Ho, Wo, C)


# ---------------------------------------------------------------------------
# Conv glue (im2col layout plumbing; all compute runs in the matmul kernel)
# ---------------------------------------------------------------------------
def _im2col(x, kh, kw, stride, pad):
    N, H, W, C = x.shape
    xp = jnp.pad(x, ((0, 0), (pad, pad), (pad, pad), (0, 0)))
    Ho = (H + 2 * pad - kh) // stride + 1
    Wo = (W + 2 * pad - kw) // stride + 1
    cols = []
    for i in range(kh):
        for j in range(kw):
            cols.append(
                xp[:, i:i + stride * (Ho - 1) + 1:stride,
                      j:j + stride * (Wo - 1) + 1:stride, :]
            )
    col = jnp.stack(cols, axis=3)                       # (N,Ho,Wo,kh*kw,C)
    return col.reshape(N * Ho * Wo, kh * kw * C), N, Ho, Wo


def conv2d(x, w, b, stride, pad, relu=False, residual=None):
    """x: NHWC, w: (kh,kw,Cin,Cout), b: (Cout,), residual: NHWC (fused add)."""
    # TODO(synk): fully im2col-free conv (per-tap accumulation reading shifted
    # HBM views inside the pipeline) not implemented; im2col stays as glue.
    kh, kw, cin, cout = w.shape
    col, N, Ho, Wo = _im2col(x, kh, kw, stride, pad)
    wmat = w.reshape(kh * kw * cin, cout)
    res2d = residual.reshape(N * Ho * Wo, cout) if residual is not None else None
    out = matmul_fused(col, wmat, b, residual=res2d, relu=relu)
    return out.reshape(N, Ho, Wo, cout)


# ---------------------------------------------------------------------------
# Parameter init (deterministic, matches nn.init.xavier_uniform_ / zeros_)
# ---------------------------------------------------------------------------
def _xavier_conv(key, kh, kw, cin, cout):
    bound = (6.0 / (cin * kh * kw + cout * kh * kw)) ** 0.5
    return jax.random.uniform(key, (kh, kw, cin, cout), jnp.float32, -bound, bound)


def _xavier_linear(key, fin, fout):
    bound = (6.0 / (fin + fout)) ** 0.5
    return jax.random.uniform(key, (fin, fout), jnp.float32, -bound, bound)


def _make_res_block_params(key, cin, cout):
    k1, k2, k3 = jax.random.split(key, 3)
    p = {
        "w1": _xavier_conv(k1, 3, 3, cin, cout), "b1": jnp.zeros((cout,), jnp.float32),
        "w2": _xavier_conv(k2, 3, 3, cout, cout), "b2": jnp.zeros((cout,), jnp.float32),
    }
    if cin != cout:
        p["w3"] = _xavier_conv(k3, 1, 1, cin, cout)
        p["b3"] = jnp.zeros((cout,), jnp.float32)
    return p


def make_params(key, num_blocks_list):
    assert len(num_blocks_list) == 4
    n_keys = 3 + sum(num_blocks_list)
    keys = iter(jax.random.split(key, n_keys))
    params = {
        "pre_w": _xavier_conv(next(keys), 7, 7, 3, 64),
        "pre_b": jnp.zeros((64,), jnp.float32),
        "bn_gamma": jnp.ones((64,), jnp.float32),
        "bn_beta": jnp.zeros((64,), jnp.float32),
    }
    cfg = [
        (64, 64, 1, num_blocks_list[0]),
        (64, 128, 2, num_blocks_list[1]),
        (128, 256, 2, num_blocks_list[2]),
        (256, 512, 2, num_blocks_list[3]),
    ]
    stages = []
    for cin, cout, stride, nb in cfg:
        blocks = [(_make_res_block_params(next(keys), cin, cout), stride)]
        for _ in range(nb - 1):
            blocks.append((_make_res_block_params(next(keys), cout, cout), 1))
        stages.append(blocks)
    params["stages"] = stages
    params["fc1_w"] = _xavier_linear(next(keys), 512, 1000)
    params["fc1_b"] = jnp.zeros((1000,), jnp.float32)
    params["fc2_w"] = _xavier_linear(next(keys), 1000, 10)
    params["fc2_b"] = jnp.zeros((10,), jnp.float32)
    return params


# ---------------------------------------------------------------------------
# Forward pass (residual='add')
# ---------------------------------------------------------------------------
def res_block(x, p, stride):
    y = conv2d(x, p["w1"], p["b1"], stride, 1, relu=True)        # conv1 + ReLU
    if "w3" in p:
        xs = conv2d(x, p["w3"], p["b3"], stride, 0, relu=False)  # 1x1 shortcut
    else:
        xs = x                                                   # Identity shortcut
    # conv2 with fused (+ shortcut, ReLU) epilogue: relu(conv2(y) + b2 + xs)
    return conv2d(y, p["w2"], p["b2"], 1, 1, relu=True, residual=xs)


def resnet_bn_forward(params, x_nchw):
    x = jnp.transpose(x_nchw, (0, 2, 3, 1))                      # NCHW -> NHWC

    # pre_block: Conv(3->64,k7,s2,p3) -> BatchNorm2d -> ReLU -> MaxPool(3,2)
    y = conv2d(x, params["pre_w"], params["pre_b"], 2, 3, relu=False)
    # BatchNorm2d training-mode statistics (biased var, eps=1e-5) -- tiny glue
    eps = 1e-5
    mean = jnp.mean(y, axis=(0, 1, 2))
    var = jnp.mean((y - mean) ** 2, axis=(0, 1, 2))
    scale = params["bn_gamma"] / jnp.sqrt(var + eps)
    shift = params["bn_beta"] - mean * scale
    # fused BN-affine + ReLU + 3x3/s2 max-pool (single Pallas kernel)
    y = bn_relu_maxpool_3x3_s2(y, scale, shift)

    # residual stages
    for blocks in params["stages"]:
        for p, stride in blocks:
            y = res_block(y, p, stride)

    # post_block: AdaptiveAvgPool2d((1,1)) -> Flatten -> Linear(512,1000)
    feat = jnp.mean(y, axis=(1, 2))                              # (N, 512), tiny glue
    logits = matmul_fused(feat, params["fc1_w"], params["fc1_b"], relu=False)
    # adaptor: Linear(1000, 10)
    out = matmul_fused(logits, params["fc2_w"], params["fc2_b"], relu=False)
    return out


# TODO(synk): train_model / validate (optimizer, loss, data-loader loops) are
# host-side training utilities with no Pallas-kernel equivalent; only forward()
# is implemented here.


if __name__ == "__main__":
    key = jax.random.PRNGKey(0)
    kp, kx = jax.random.split(key)

    num_blocks_list = [1, 1, 1, 1]
    params = make_params(kp, num_blocks_list)

    # small input consistent with the module: NCHW, 3 channels, 32x32 spatial
    x = jax.random.normal(kx, (2, 3, 32, 32), dtype=jnp.float32)

    out = resnet_bn_forward(params, x)
    out = jax.block_until_ready(out)
    assert out.shape == (2, 10), out.shape
    assert bool(jnp.all(jnp.isfinite(out)))
    print("KERNEL_OK")
</pallas_src>

<mosaic_0001>
module attributes {stable_mosaic.version = 11 : i64} {
  func.func @_mm_fused_kernel(%arg0: i32, %arg1: i32, %arg2: i32, %arg3: memref<256x256xbf16, #tpu.memory_space<vmem>>, %arg4: memref<256x128xbf16, #tpu.memory_space<vmem>>, %arg5: memref<1x128xf32, #tpu.memory_space<vmem>>, %arg6: memref<256x128xf32, #tpu.memory_space<vmem>>, %arg7: memref<256x128xf32, #tpu.memory_space<vmem>>) attributes {dimension_semantics = [#tpu.dimension_semantics<parallel>, #tpu.dimension_semantics<parallel>, #tpu.dimension_semantics<arbitrary>], iteration_bounds = array<i64: 2, 1, 1>, scalar_prefetch = 0 : i64, scratch_operands = 1 : i64, tpu.core_type = #tpu.core_type<tc>, window_params = [{transform_indices = @transform_0, window_bounds = array<i64: 256, 256>}, {transform_indices = @transform_1, window_bounds = array<i64: 256, 128>}, {transform_indices = @transform_2, window_bounds = array<i64: 1, 128>}, {transform_indices = @transform_3, window_bounds = array<i64: 256, 128>}]} {
    %c0_i32 = arith.constant 0 : i32
    %0 = arith.cmpi eq, %arg2, %c0_i32 : i32
    %1 = arith.extui %0 : i1 to i32
    %c0_i32_0 = arith.constant 0 : i32
    %2 = arith.cmpi ne, %1, %c0_i32_0 : i32
    scf.if %2 {
      %cst_10 = arith.constant 0.000000e+00 : f32
      %12 = vector.broadcast %cst_10 : f32 to vector<256x128xf32>
      %c0_11 = arith.constant 0 : index
      %c0_12 = arith.constant 0 : index
      %13 = vector.load %arg7[%c0_11, %c0_12] : memref<256x128xf32, #tpu.memory_space<vmem>>, vector<256x128xf32>
      tpu.vector_store %arg7[%c0_11, %c0_12], %12 {strides = array<i32>} : memref<256x128xf32, #tpu.memory_space<vmem>>, vector<256x128xf32>,
    } else {
    }
    %c0 = arith.constant 0 : index
    %c0_1 = arith.constant 0 : index
    %3 = vector.load %arg7[%c0, %c0_1] : memref<256x128xf32, #tpu.memory_space<vmem>>, vector<256x128xf32>
    %c0_2 = arith.constant 0 : index
    %c0_3 = arith.constant 0 : index
    %4 = vector.load %arg3[%c0_2, %c0_3] : memref<256x256xbf16, #tpu.memory_space<vmem>>, vector<256x256xbf16>
    %c0_4 = arith.constant 0 : index
    %c0_5 = arith.constant 0 : index
    %5 = vector.load %arg4[%c0_4, %c0_5] : memref<256x128xbf16, #tpu.memory_space<vmem>>, vector<256x128xbf16>
    %cst = arith.constant dense<0.000000e+00> : vector<256x128xf32>
    %6 = tpu.matmul %4, %5, %cst {dimension_numbers = #tpu.dot_dimension_numbers<[1], [0], [0], [1], [0, 0, 1, 1], [], []>} : vector<256x256xbf16>, vector<256x128xbf16>, vector<256x128xf32> -> vector<256x128xf32>
    %7 = arith.addf %3, %6 : vector<256x128xf32>
    %c0_6 = arith.constant 0 : index
    %c0_7 = arith.constant 0 : index
    %8 = vector.load %arg7[%c0_6, %c0_7] : memref<256x128xf32, #tpu.memory_space<vmem>>, vector<256x128xf32>
    tpu.vector_store %arg7[%c0_6, %c0_7], %7 {strides = array<i32>} : memref<256x128xf32, #tpu.memory_space<vmem>>, vector<256x128xf32>,
    %c0_i32_8 = arith.constant 0 : i32
    %9 = arith.cmpi eq, %arg2, %c0_i32_8 : i32
    %10 = arith.extui %9 : i1 to i32
    %c0_i32_9 = arith.constant 0 : i32
    %11 = arith.cmpi ne, %10, %c0_i32_9 : i32
    scf.if %11 {
      %c0_10 = arith.constant 0 : index
      %c0_11 = arith.constant 0 : index
      %12 = vector.load %arg7[%c0_10, %c0_11] : memref<256x128xf32, #tpu.memory_space<vmem>>, vector<256x128xf32>
      %c0_12 = arith.constant 0 : index
      %c0_13 = arith.constant 0 : index
      %13 = vector.load %arg5[%c0_12, %c0_13] : memref<1x128xf32, #tpu.memory_space<vmem>>, vector<1x128xf32>
      %14 = vector.broadcast %13 : vector<1x128xf32> to vector<256x128xf32>
      %15 = arith.addf %12, %14 : vector<256x128xf32>
      %c0_14 = arith.constant 0 : index
      %c0_15 = arith.constant 0 : index
      %16 = vector.load %arg6[%c0_14, %c0_15] : memref<256x128xf32, #tpu.memory_space<vmem>>, vector<256x128xf32>
      tpu.vector_store %arg6[%c0_14, %c0_15], %15 {strides = array<i32>} : memref<256x128xf32, #tpu.memory_space<vmem>>, vector<256x128xf32>,
    } else {
    }
    return
  }
  func.func @transform_0(%arg0: i32, %arg1: i32, %arg2: i32) -> (i32, i32) {
    %c0_i32 = arith.constant 0 : i32
    return %arg0, %arg2 : i32, i32
  }
  func.func @transform_1(%arg0: i32, %arg1: i32, %arg2: i32) -> (i32, i32) {
    %c0_i32 = arith.constant 0 : i32
    return %arg2, %arg1 : i32, i32
  }
  func.func @transform_2(%arg0: i32, %arg1: i32, %arg2: i32) -> (i32, i32) {
    %c0_i32 = arith.constant 0 : i32
    %c0_i32_0 = arith.constant 0 : i32
    return %c0_i32, %arg1 : i32, i32
  }
  func.func @transform_3(%arg0: i32, %arg1: i32, %arg2: i32) -> (i32, i32) {
    %c0_i32 = arith.constant 0 : i32
    return %arg0, %arg1 : i32, i32
  }
}

</mosaic_0001>

<bundles_post_ra>
// kernel: tpu_custom_call.1
= control target key start
LH: loop header
LB: loop body
LE: loop exit
PB: predicated region body
PF: predicated region fallthrough
CT: control target
= control target key end

     0   :  { %8 = vsyncpa [#allocation4], 0  ;;  %s1955_s0 = inlined_call_operand.hbm [shape: bf16[512,256], index: 0, kind: input, shape index: {}]   ;;  %s1956_s1 = inlined_call_operand.hbm [shape: bf16[256,128], index: 1, kind: input, shape index: {}]   ;;  %s1957_s2 = inlined_call_operand.vmem [shape: f32[1,128], index: 2, kind: input, shape index: {}]   ;;  %s1958_s3 = inlined_call_operand.hbm [shape: f32[512,128], index: 3, kind: output, shape index: {}]  }
   0x1   :  { %10 = vsyncpa [#allocation4 + $0x1], 0 }
   0x2   :  { %11 = vsyncpa [#allocation7], 0 }
   0x3   :  { %12 = vsyncpa [#allocation5], 0 }
   0x4   :  { %14 = vsyncpa [#allocation5 + $0x1], 0  ;;  %s1626_s12 = smov 0   ;;  %s1628_s13 = smov 0  }
   0x5   :  { %s1630_s14 = smov 0   ;;  %s1632_s15 = smov 0  }
   0x6   :  { %s1634_s16 = smov 0   ;;  %s1636_s17 = smov 0  }
   0x7 LB: > { %s1109_s18 = sadd.s32 4294967295, %s1595_s17   ;;  %s1110_s19 = sadd.s32 4294967294, %s1595_s17   ;;  %s1595_s17 = sphi %s1636_s17, %s20_s17   ;;  %s1591_s16 = sphi %s1634_s16, %s1982_s16   ;;  %s1587_s15 = sphi %s1632_s15, %s1981_s15   ;;  %s1583_s14 = sphi %s1630_s14, %s1980_s14   ;;  %s1579_s13 = sphi %s1628_s13, %s1979_s13   ;;  %s1575_s12 = sphi %s1626_s12, %s1978_s12  }
   0x8   : > { %p61_p0 = scmp.ne.s32.totalorder %s1579_s13, %s1575_s12  ;;  %p1660_p1 = scmp.eq.s32.totalorder %s1109_s18, 0 }
   0x9   : > { %p1664_p2 = scmp.eq.s32.totalorder %s1109_s18, 1  ;;  %p147_p3 = scmp.eq.s32.totalorder %s1110_s19, 1 }
   0xa   : > { %s1963_s20 = scalar_select %p1660_p1, 1, 0 }
   0xb   : > { %s1964_s21 = scalar_select %p1664_p2, 1, 0 }
   0xc   : > { %p1670_p4 = por %p1660_p1, %p61_p0  ;;  %p1111_p5 = scmp.ge.s32.totalorder %s1595_s17, 1 }
   0xd   : > { %p1675_p6 = por %p147_p3, %p61_p0  ;;  %p154_p7 = scmp.lt.s32.totalorder %s1595_s17, 3 }
   0xe   : > { %s1965_s22 = scalar_select %p1670_p4, 1, 0 }
   0xf   : > { %s1966_s23 = scalar_select %p1675_p6, 1, 0 }
  0x10   : > { %p1680_p8 = pnand %p1111_p5, %p154_p7  ;;  %s1597_s25 = smov [#allocation6]  }
  0x11   : > { %s170_s26 = sshll.u32 %s1597_s25, 4  ;;  %s39_s28 = sadd.s32 1, %s1591_s16  ;;  %s171_s26 = int_to_ptr.vmem [resolvable:$true] %s170_s26 }
  0x12   : > { %s1967_s24 = scalar_select %p1680_p8, 1, 0 }
  0x13   : > { %p1316_p9 = pneg %p1680_p8  ;;  %s1451_s4 = scalar_lea.hbm %s1956_s1, 2048 }
  0x14   : > { %p1452_p12 = scmp.ne.s32.totalorder %s1956_s1, %s1451_s4  ;;  %p1458_p5 = scmp.lt.u32.totalorder %s1451_s4, %s1956_s1 }
  0x15   : > { %p1689_p11 = pnand %p1316_p9, %p1660_p1 }
  0x17   : > { %p1453_p13 = pneg %p1689_p11 }
  0x19   : > { %p1454_p0 = pnand %p1453_p13, %p1452_p12 }
  0x1b   : > { %p1455_p3 = pneg %p1454_p0 }
  0x1d   : > { %p1460_p7 = pnand %p1458_p5, %p1455_p3 }
  0x1f   : > { %1463 = shalt.err (!%p1460_p7)
}
  0x20   : > { %s1464_s9 = scalar_lea.vmem %s171_s26, 2048  ;;  %p1472_p1 = scmp.lt.s32.totalorder %s171_s26, %s171_s26 }
  0x21   : > { %p1465_p9 = scmp.ne.s32.totalorder %s171_s26, %s1464_s9  ;;  %p1473_p4 = scmp.lt.s32.totalorder %s1464_s9, %s1464_s9 }
  0x23   : > { %p1467_p10 = pnand %p1465_p9, %p1453_p13  ;;  %p1474_p8 = por %p1473_p4, %p1472_p1 }
  0x25   : > { %p1468_p6 = pneg %p1467_p10 }
  0x27   : > { %p1475_p2 = pnand %p1474_p8, %p1468_p6 }
  0x29   : > { %1478 = shalt.err (!%p1475_p2)
}
  0x2a   : > { %s1598_s10 = smov 64   ;;  %s1599_s11 = smov 4  }
  0x2b   : > { %1319 = dma.hbm_to_vmem [thread:$0]  (!%p1689_p11), %s1956_s1, 2048, %s171_s26, [#allocation7], %s1598_s10, %s1598_s10, %s1599_s11  }
  0x2c   : > { %p41_p1 = scmp.ge.s32.totalorder %s39_s28, 2  ;;  %s48_s25 = sadd.s32 1, %s1583_s14 }
  0x2d   : > { %p55_p2 = scmp.ne.s32.totalorder %s1583_s14, %s1579_s13  ;;  %p56_p4 = scmp.eq.s32.totalorder %s1595_s17, 0 }
  0x2e   : > { %s1984_s28 = smov (%p41_p1, %s39_s28), 0  ;;  %p1970_p8 = scmp.ne.s32.totalorder %s1964_s21, 0 }
  0x2f   : > { %p1716_p6 = por %p56_p4, %p55_p2  ;;  %s43_s27 = ssub.s32 %s1591_s16, %s1984_s28 }
  0x30   : > { %p1722_p10 = por %p1970_p8, %p55_p2  ;;  %p1329_p12 = scmp.lt.s32.totalorder %s1595_s17, 2 }
  0x31   : > { %p46_p11 = scmp.eq.s32.totalorder %s43_s27, 0  ;;  %s190_s26 = sand.u32 1, %s1583_s14  }
  0x32   : > { %s1115_s4 = sshll.u32 %s190_s26, 8  ;;  %s1178_s6 = sshll.u32 %s1591_s16, 12 }
  0x33   : > { %s1731_s5 = scalar_select %p46_p11, %s1583_s14, %s48_s25  }
  0x34   : > { %s1737_s9 = scalar_lea.hbm %s1955_s0, %s1178_s6  ;;  %s194_s21 = scalar_lea.vmem [#allocation3], %s1115_s4 }
  0x35   : > { %s204_s10 = sshll.u32 %s194_s21, 4  ;;  %p1743_p13 = pnand %p1329_p12, %p1716_p6  ;;  %s1739_s10 = int_to_ptr.vmem [resolvable:$true] %s204_s10 }
  0x36   : > { %s1747_s18 = scalar_lea.sflag [#allocation4], %s190_s26  ;;  %s1479_s19 = scalar_lea.hbm %s1737_s9, 4096 }
  0x37   : > { %p1480_p0 = scmp.ne.s32.totalorder %s1737_s9, %s1479_s19  ;;  %p1481_p3 = pneg %p1743_p13 }
  0x38   : > { %s1484_s29 = scalar_lea.hbm %s1955_s0, 8192  ;;  %p1485_p9 = scmp.lt.u32.totalorder %s1737_s9, %s1955_s0 }
  0x39   : > { %p1482_p5 = pnand %p1481_p3, %p1480_p0  ;;  %p1486_p1 = scmp.lt.u32.totalorder %s1484_s29, %s1479_s19 }
  0x3a   : > { %p1488_p4 = scmp.lt.u32.totalorder %s1479_s19, %s1737_s9 }
  0x3b   : > { %p1483_p7 = pneg %p1482_p5  ;;  %p1487_p2 = por %p1486_p1, %p1485_p9 }
  0x3d   : > { %p1489_p6 = por %p1488_p4, %p1487_p2 }
  0x3f   : > { %p1490_p8 = pnand %p1489_p6, %p1483_p7 }
  0x41   : > { %1493 = shalt.err (!%p1490_p8)
}
  0x42   : > { %s1494_s26 = scalar_lea.vmem %s1739_s10, 4096  ;;  %s1600_s7 = smov [#allocation3]  }
  0x43   : > { %p1495_p12 = scmp.ne.s32.totalorder %s1739_s10, %s1494_s26  ;;  %s1499_s8 = sshll.u32 %s1600_s7, 4  ;;  %s1500_s8 = int_to_ptr.vmem [resolvable:$false] %s1499_s8 }
  0x44   : > { %s1501_s21 = scalar_lea.vmem %s1500_s8, 8192  ;;  %p1502_p5 = scmp.lt.s32.totalorder %s1739_s10, %s1500_s8 }
  0x45   : > { %p1497_p11 = pnand %p1495_p12, %p1481_p3  ;;  %p1503_p9 = scmp.lt.s32.totalorder %s1501_s21, %s1494_s26 }
  0x47   : > { %p1498_p0 = pneg %p1497_p11  ;;  %p1504_p1 = por %p1503_p9, %p1502_p5 }
  0x49   : > { %p1505_p2 = pnand %p1504_p1, %p1498_p0 }
  0x4b   : > { %1508 = shalt.err (!%p1505_p2)
}
  0x4c   : > { %s1601_s19 = smov 128   ;;  %s1602_s25 = smov 8  }
  0x4d   : > { %1323 = dma.hbm_to_vmem [thread:$0]  (!%p1743_p13), %s1737_s9, 4096, %s1739_s10, %s1747_s18, %s1601_s19, %s1601_s19, %s1602_s25  }
  0x4e   : > { %p1973_p3 = scmp.ne.s32.totalorder %s1967_s24, 0 }
  0x4f   : > { %s1778_s27 = sand.u32 (!%p1973_p3), 1, %s1579_s13   ;;  %p1974_p7 = scmp.ne.s32.totalorder (!%p1973_p3), %s1965_s22, 0 }
  0x50   : > { %216 = sbr.rel (%p1973_p3) target bundleno = 414 (0x19e), region = 32  ;;  %s1120_s29 = sshll.u32 (!%p1973_p3), %s1778_s27, 8 }
  0x51   : > { %s219_s4 = scalar_lea.sflag (!%p1973_p3), [#allocation4], %s1778_s27  ;;  %s1784_s6 = scalar_lea.vmem (!%p1973_p3), [#allocation3], %s1120_s29 }
  0x57   : > { %1562 = dma.done.wait (%p1974_p7), %s219_s4, 4096  }
  0x58   : > { %1564 = vsyncadd (%p1974_p7), %s219_s4, 4294963200  ;;  %p1975_p13 = scmp.ne.s32.totalorder %s1963_s20, 0 }
  0x5a   : > { %1566 = dma.done.wait (%p1975_p13), [#allocation7], 2048  }
  0x5b   : > { %1568 = vsyncadd (%p1975_p13), [#allocation7], 4294965248  ;;  %v1387_v0 = vld [vmem:[#allocation6 + $0x40] sm:$0xff]   ;;  %v1389_v2 = vld [vmem:[#allocation6 + $0x48] sm:$0xff]   ;;  %s1835_s24 = scalar_lea.vmem [#allocation8], %s1120_s29  ;;  %s1179_s9 = sshll.u32 %s1587_s15, 12 }
  0x5c   : > { %v1388_v1 = vld [vmem:[#allocation6] sm:$0xff]   ;;  %1180 = vmatprep.subr.bf16.mxu0 %v1387_v0  ;;  %1292 = vmatprep.subr.bf16.mxu1 %v1387_v0  ;;  %v1390_v3 = vld [vmem:[#allocation6 + $0x8] sm:$0xff]   ;;  %v1391_v4 = vld [vmem:[#allocation6 + $0x50] sm:$0xff]   ;;  %s994_s10 = sshll.u32 %s1835_s24, 4  ;;  %s1898_s26 = scalar_lea.hbm %s1958_s3, %s1179_s9  ;;  %s1900_s10 = int_to_ptr.vmem [resolvable:$true] %s994_s10 }
  0x5d   : > { %1181 = vmatpush3.bf16.msra.mxu0 %v1388_v1  ;;  %1300 = vmatpush3.bf16.msra.mxu1 %v1388_v1  ;;  %v1392_v5 = vld [vmem:[#allocation6 + $0x10] sm:$0xff]   ;;  %v1393_v6 = vld [vmem:[#allocation6 + $0x58] sm:$0xff]   ;;  %v1395_v8 = vld [vmem:[#allocation6 + $0x60] sm:$0xff]   ;;  %s980_s15 = scalar_lea.sflag [#allocation5], %s1778_s27  ;;  %s1509_s7 = scalar_lea.vmem %s1900_s10, 4096 }
  0x5e   : > { %1182 = vmatprep.subr.bf16.mxu0 %v1389_v2  ;;  %1293 = vmatprep.subr.bf16.mxu1 %v1389_v2  ;;  %v1394_v7 = vld [vmem:[#allocation6 + $0x18] sm:$0xff]   ;;  %v1396_v9 = vld [vmem:[#allocation6 + $0x20] sm:$0xff]   ;;  %v1397_v10 = vld [vmem:[#allocation6 + $0x68] sm:$0xff]   ;;  %p1510_p4 = scmp.ne.s32.totalorder %s1900_s10, %s1509_s7  ;;  %s1603_s8 = smov [#allocation8]  }
  0x5f   : > { %v1405_v11 = vld [vmem:[%s1784_s6 + $0x4] ss:$8 sps:$4 sm:$0xff]   ;;  %v1399_v14 = vld [vmem:[#allocation6 + $0x70] sm:$0xff]   ;;  %v1401_v16 = vld [vmem:[#allocation6 + $0x78] sm:$0xff]   ;;  %s1513_s21 = sshll.u32 %s1603_s8, 4  ;;  %s1514_s21 = int_to_ptr.vmem [resolvable:$false] %s1513_s21 }
  0x60   : > { %v1408_v12 = vld [vmem:[%s1784_s6 + $0x84] ss:$8 sps:$4 sm:$0xff]   ;;  %680 = vmatprep.mubr.bf16.mxu0 %v1405_v11  ;;  %v1400_v15 = vld [vmem:[#allocation6 + $0x30] sm:$0xff]   ;;  %v1402_v17 = vld [vmem:[#allocation6 + $0x38] sm:$0xff]   ;;  %p1511_p6 = pnand %p1510_p4, %p1722_p10  ;;  %s1515_s19 = scalar_lea.vmem %s1514_s21, 8192 }
  0x61   : > { %1183 = vmatpush3.bf16.msra.mxu0 %v1390_v3  ;;  %1301 = vmatpush3.bf16.msra.mxu1 %v1390_v3  ;;  %v1398_v13 = vld [vmem:[#allocation6 + $0x28] sm:$0xff]   ;;  %v1409_v20 = vld [vmem:[%s1784_s6 + $0x14] ss:$8 sps:$4 sm:$0xff]   ;;  %v1413_v22 = vld [vmem:[%s1784_s6 + $0x10] ss:$8 sps:$4 sm:$0xff]   ;;  %p1516_p12 = scmp.lt.s32.totalorder %s1900_s10, %s1514_s21  ;;  %p1517_p11 = scmp.lt.s32.totalorder %s1515_s19, %s1509_s7 }
  0x62   : > { %1184 = vmatprep.subr.bf16.mxu0 %v1391_v4  ;;  %1294 = vmatprep.subr.bf16.mxu1 %v1391_v4  ;;  %v1403_v18 = vld [vmem:[%s1784_s6] ss:$8 sps:$4 sm:$0xff]   ;;  %v1411_v21 = vld [vmem:[%s1784_s6 + $0x94] ss:$8 sps:$4 sm:$0xff]   ;;  %v1414_v23 = vld [vmem:[%s1784_s6 + $0x90] ss:$8 sps:$4 sm:$0xff]   ;;  %p1512_p8 = pneg %p1511_p6 }
  0x63   : > { %744 = vmatprep.mubr.bf16.mxu1 %v1408_v12  ;;  %v1406_v19 = vld [vmem:[%s1784_s6 + $0x80] ss:$8 sps:$4 sm:$0xff]   ;;  %v1415_v24 = vld [vmem:[%s1784_s6 + $0x24] ss:$8 sps:$4 sm:$0xff]   ;;  %v1421_v28 = vld [vmem:[%s1784_s6 + $0x34] ss:$8 sps:$4 sm:$0xff]   ;;  %p1518_p0 = por %p1517_p11, %p1516_p12 }
  0x64   : > { %v1417_v25 = vld [vmem:[%s1784_s6 + $0xa4] ss:$8 sps:$4 sm:$0xff]   ;;  %v1419_v26 = vld [vmem:[%s1784_s6 + $0x20] ss:$8 sps:$4 sm:$0xff]   ;;  %v1423_v29 = vld [vmem:[%s1784_s6 + $0xb4] ss:$8 sps:$4 sm:$0xff]  }
  0x65   : > { %1185 = vmatpush3.bf16.msra.mxu0 %v1392_v5  ;;  %1302 = vmatpush3.bf16.msra.mxu1 %v1392_v5  ;;  %v1420_v27 = vld [vmem:[%s1784_s6 + $0xa0] ss:$8 sps:$4 sm:$0xff]   ;;  %v1425_v30 = vld [vmem:[%s1784_s6 + $0x30] ss:$8 sps:$4 sm:$0xff]   ;;  %v1427_v32 = vld [vmem:[%s1784_s6 + $0x44] ss:$8 sps:$4 sm:$0xff]   ;;  %p1519_p5 = pnand %p1518_p0, %p1512_p8 }
  0x66   : > { %1186 = vmatprep.subr.bf16.mxu0 %v1393_v6  ;;  %1295 = vmatprep.subr.bf16.mxu1 %v1393_v6  ;;  %v1426_v31 = vld [vmem:[%s1784_s6 + $0xb0] ss:$8 sps:$4 sm:$0xff]   ;;  %v1429_v33 = vld [vmem:[%s1784_s6 + $0xc4] ss:$8 sps:$4 sm:$0xff]   ;;  %v1431_v34 = vld [vmem:[%s1784_s6 + $0x40] ss:$8 sps:$4 sm:$0xff]  }
  0x67   : > { %v1432_v35 = vld [vmem:[%s1784_s6 + $0xc0] ss:$8 sps:$4 sm:$0xff]   ;;  %v1433_v36 = vld [vmem:[%s1784_s6 + $0x54] ss:$8 sps:$4 sm:$0xff]   ;;  %v1437_v38 = vld [vmem:[%s1784_s6 + $0x50] ss:$8 sps:$4 sm:$0xff]  }
  0x68   : > { %v1435_v37 = vld [vmem:[%s1784_s6 + $0xd4] ss:$8 sps:$4 sm:$0xff]   ;;  %v1438_v39 = vld [vmem:[%s1784_s6 + $0xd0] ss:$8 sps:$4 sm:$0xff]   ;;  %v1439_v40 = vld [vmem:[%s1784_s6 + $0x64] ss:$8 sps:$4 sm:$0xff]  }
  0x69   : > { %1187 = vmatpush3.bf16.msra.mxu0 %v1394_v7  ;;  %1303 = vmatpush3.bf16.msra.mxu1 %v1394_v7  ;;  %v1441_v41 = vld [vmem:[%s1784_s6 + $0xe4] ss:$8 sps:$4 sm:$0xff]   ;;  %v1443_v42 = vld [vmem:[%s1784_s6 + $0x60] ss:$8 sps:$4 sm:$0xff]   ;;  %v1445_v44 = vld [vmem:[%s1784_s6 + $0x74] ss:$8 sps:$4 sm:$0xff]  }
  0x6a   : > { %1188 = vmatprep.subr.bf16.mxu0 %v1395_v8  ;;  %1296 = vmatprep.subr.bf16.mxu1 %v1395_v8  ;;  %v1444_v43 = vld [vmem:[%s1784_s6 + $0xe0] ss:$8 sps:$4 sm:$0xff]   ;;  %v1447_v45 = vld [vmem:[%s1784_s6 + $0xf4] ss:$8 sps:$4 sm:$0xff]   ;;  %v1449_v46 = vld [vmem:[%s1784_s6 + $0x70] ss:$8 sps:$4 sm:$0xff]  }
  0x6b   : > { %v1450_v47 = vld [vmem:[%s1784_s6 + $0xf0] ss:$8 sps:$4 sm:$0xff]   ;;  %v1829_v51 = vld [vmem:[%s1957_s2] ss:$0 sm:$0xff] }
  0x6d   : > { %1189 = vmatpush3.bf16.msra.mxu0 %v1396_v9  ;;  %1304 = vmatpush3.bf16.msra.mxu1 %v1396_v9 }
  0x6e   : > { %1190 = vmatprep.subr.bf16.mxu0 %v1397_v10  ;;  %1297 = vmatprep.subr.bf16.mxu1 %v1397_v10 }
  0x71   : > { %1191 = vmatpush3.bf16.msra.mxu0 %v1398_v13  ;;  %1305 = vmatpush3.bf16.msra.mxu1 %v1398_v13 }
  0x72   : > { %1192 = vmatprep.subr.bf16.mxu0 %v1399_v14  ;;  %1298 = vmatprep.subr.bf16.mxu1 %v1399_v14 }
  0x75   : > { %1193 = vmatpush3.bf16.msra.mxu0 %v1400_v15  ;;  %1306 = vmatpush3.bf16.msra.mxu1 %v1400_v15 }
  0x76   : > { %1194 = vmatprep.subr.bf16.mxu0 %v1401_v16  ;;  %1299 = vmatprep.subr.bf16.mxu1 %v1401_v16 }
  0x79   : > { %1195 = vmatpush3.bf16.msra.mxu0 %v1402_v17  ;;  %1307 = vmatpush3.bf16.msra.mxu1 %v1402_v17 }
  0x7c   : > { %681 = vmatmul.mubr.bf16.vlgmr.msra.gmra.mrb[0].mxu0 %v1403_v18  ;;  %745 = vmatmul.mubr.bf16.vlgmr.msra.gmra.mrb[0].mxu1 %v1406_v19 }
  0x7d   : > { %688 = vmatprep.mubr.bf16.mxu0 %v1409_v20  ;;  %752 = vmatprep.mubr.bf16.mxu1 %v1411_v21 }
  0x84   : > { %689 = vmatmul.mubr.bf16.gmra.mrb[4].mxu0 %v1413_v22  ;;  %753 = vmatmul.mubr.bf16.gmra.mrb[4].mxu1 %v1414_v23 }
  0x85   : > { %696 = vmatprep.mubr.bf16.mxu0 %v1415_v24  ;;  %760 = vmatprep.mubr.bf16.mxu1 %v1417_v25 }
  0x8c   : > { %697 = vmatmul.mubr.bf16.gmra.mrb[8].mxu0 %v1419_v26  ;;  %761 = vmatmul.mubr.bf16.gmra.mrb[8].mxu1 %v1420_v27 }
  0x8d   : > { %704 = vmatprep.mubr.bf16.mxu0 %v1421_v28  ;;  %768 = vmatprep.mubr.bf16.mxu1 %v1423_v29 }
  0x94   : > { %705 = vmatmul.mubr.bf16.gmra.mrb[12].mxu0 %v1425_v30  ;;  %769 = vmatmul.mubr.bf16.gmra.mrb[12].mxu1 %v1426_v31 }
  0x95   : > { %712 = vmatprep.mubr.bf16.mxu0 %v1427_v32  ;;  %776 = vmatprep.mubr.bf16.mxu1 %v1429_v33 }
  0x9c   : > { %713 = vmatmul.mubr.bf16.gmra.mrb[16].mxu0 %v1431_v34  ;;  %777 = vmatmul.mubr.bf16.gmra.mrb[16].mxu1 %v1432_v35 }
  0x9d   : > { %720 = vmatprep.mubr.bf16.mxu0 %v1433_v36  ;;  %784 = vmatprep.mubr.bf16.mxu1 %v1435_v37 }
  0xa4   : > { %721 = vmatmul.mubr.bf16.gmra.mrb[20].mxu0 %v1437_v38  ;;  %785 = vmatmul.mubr.bf16.gmra.mrb[20].mxu1 %v1438_v39 }
  0xa5   : > { %728 = vmatprep.mubr.bf16.mxu0 %v1439_v40  ;;  %792 = vmatprep.mubr.bf16.mxu1 %v1441_v41 }
  0xac   : > { %729 = vmatmul.mubr.bf16.gmra.mrb[24].mxu0 %v1443_v42  ;;  %793 = vmatmul.mubr.bf16.gmra.mrb[24].mxu1 %v1444_v43 }
  0xad   : > { %736 = vmatprep.mubr.bf16.mxu0 %v1445_v44  ;;  %800 = vmatprep.mubr.bf16.mxu1 %v1447_v45 }
  0xb4   : > { %737 = vmatmul.mubr.bf16.gmra.mrb[28].mxu0 %v1449_v46  ;;  %801 = vmatmul.mubr.bf16.gmra.mrb[28].mxu1 %v1450_v47 }
 0x14f   : > { %v1196_v48 = vpop.f32.mrb[0].mxu0  ;;  %v1244_v49 = vpop.f32.mrb[0].mxu1 }
 0x150   : > { %v1197_v50 = vpop.f32.mrb[1].mxu0  ;;  %v1245_v52 = vpop.f32.mrb[1].mxu1 }
 0x151   : > { %v1198_v53 = vadd.f32 %v1197_v50, %v1196_v48  ;;  %v1246_v54 = vadd.f32 %v1245_v52, %v1244_v49  ;;  %v1199_v55 = vpop.f32.mrb[2].mxu0  ;;  %v1247_v56 = vpop.f32.mrb[2].mxu1 }
 0x152   : > { %v1200_v57 = vpop.f32.mrb[3].mxu0  ;;  %v1248_v58 = vpop.f32.mrb[3].mxu1 }
 0x153   : > { %v915_v59 = vadd.f32 %v1198_v53, %v1829_v51  ;;  %v931_v60 = vadd.f32 %v1246_v54, %v1829_v51  ;;  %v1201_v61 = vadd.f32 %v1200_v57, %v1199_v55  ;;  %v1249_v62 = vadd.f32 %v1248_v58, %v1247_v56 }
 0x155   : > { %947 = vst [vmem:[%s1835_s24] sm:$0xff] %v915_v59  ;;  %963 = vst [vmem:[%s1835_s24 + $0x80] sm:$0xff] %v931_v60  ;;  %v916_v63 = vadd.f32 %v1201_v61, %v1829_v51  ;;  %v932_v0 = vadd.f32 %v1249_v62, %v1829_v51 }
 0x157   : > { %948 = vst [vmem:[%s1835_s24 + $0x8] sm:$0xff] %v916_v63  ;;  %964 = vst [vmem:[%s1835_s24 + $0x88] sm:$0xff] %v932_v0  ;;  %v1202_v1 = vpop.f32.mrb[4].mxu0  ;;  %v1250_v2 = vpop.f32.mrb[4].mxu1 }
 0x158   : > { %v1203_v3 = vpop.f32.mrb[5].mxu0  ;;  %v1251_v4 = vpop.f32.mrb[5].mxu1 }
 0x159   : > { %v1204_v5 = vadd.f32 %v1203_v3, %v1202_v1  ;;  %v1252_v6 = vadd.f32 %v1251_v4, %v1250_v2  ;;  %v1205_v7 = vpop.f32.mrb[6].mxu0  ;;  %v1253_v8 = vpop.f32.mrb[6].mxu1 }
 0x15a   : > { %v1206_v9 = vpop.f32.mrb[7].mxu0  ;;  %v1254_v10 = vpop.f32.mrb[7].mxu1 }
 0x15b   : > { %v917_v11 = vadd.f32 %v1204_v5, %v1829_v51  ;;  %v933_v12 = vadd.f32 %v1252_v6, %v1829_v51  ;;  %v1207_v13 = vadd.f32 %v1206_v9, %v1205_v7  ;;  %v1255_v14 = vadd.f32 %v1254_v10, %v1253_v8 }
 0x15d   : > { %949 = vst [vmem:[%s1835_s24 + $0x10] sm:$0xff] %v917_v11  ;;  %965 = vst [vmem:[%s1835_s24 + $0x90] sm:$0xff] %v933_v12  ;;  %v918_v15 = vadd.f32 %v1207_v13, %v1829_v51  ;;  %v934_v16 = vadd.f32 %v1255_v14, %v1829_v51 }
 0x15f   : > { %950 = vst [vmem:[%s1835_s24 + $0x18] sm:$0xff] %v918_v15  ;;  %966 = vst [vmem:[%s1835_s24 + $0x98] sm:$0xff] %v934_v16  ;;  %v1208_v17 = vpop.f32.mrb[8].mxu0  ;;  %v1256_v18 = vpop.f32.mrb[8].mxu1 }
 0x160   : > { %v1209_v19 = vpop.f32.mrb[9].mxu0  ;;  %v1257_v20 = vpop.f32.mrb[9].mxu1 }
 0x161   : > { %v1210_v21 = vadd.f32 %v1209_v19, %v1208_v17  ;;  %v1258_v22 = vadd.f32 %v1257_v20, %v1256_v18  ;;  %v1211_v23 = vpop.f32.mrb[10].mxu0  ;;  %v1259_v24 = vpop.f32.mrb[10].mxu1 }
 0x162   : > { %v1212_v25 = vpop.f32.mrb[11].mxu0  ;;  %v1260_v26 = vpop.f32.mrb[11].mxu1 }
 0x163   : > { %v919_v27 = vadd.f32 %v1210_v21, %v1829_v51  ;;  %v935_v28 = vadd.f32 %v1258_v22, %v1829_v51  ;;  %v1213_v29 = vadd.f32 %v1212_v25, %v1211_v23  ;;  %v1261_v30 = vadd.f32 %v1260_v26, %v1259_v24 }
 0x165   : > { %951 = vst [vmem:[%s1835_s24 + $0x20] sm:$0xff] %v919_v27  ;;  %967 = vst [vmem:[%s1835_s24 + $0xa0] sm:$0xff] %v935_v28  ;;  %v920_v31 = vadd.f32 %v1213_v29, %v1829_v51  ;;  %v936_v32 = vadd.f32 %v1261_v30, %v1829_v51 }
 0x167   : > { %952 = vst [vmem:[%s1835_s24 + $0x28] sm:$0xff] %v920_v31  ;;  %968 = vst [vmem:[%s1835_s24 + $0xa8] sm:$0xff] %v936_v32  ;;  %v1214_v33 = vpop.f32.mrb[12].mxu0  ;;  %v1262_v34 = vpop.f32.mrb[12].mxu1 }
 0x168   : > { %v1215_v35 = vpop.f32.mrb[13].mxu0  ;;  %v1263_v36 = vpop.f32.mrb[13].mxu1 }
 0x169   : > { %v1216_v37 = vadd.f32 %v1215_v35, %v1214_v33  ;;  %v1264_v38 = vadd.f32 %v1263_v36, %v1262_v34  ;;  %v1217_v39 = vpop.f32.mrb[14].mxu0  ;;  %v1265_v40 = vpop.f32.mrb[14].mxu1 }
 0x16a   : > { %v1218_v41 = vpop.f32.mrb[15].mxu0  ;;  %v1266_v42 = vpop.f32.mrb[15].mxu1 }
 0x16b   : > { %v921_v43 = vadd.f32 %v1216_v37, %v1829_v51  ;;  %v937_v44 = vadd.f32 %v1264_v38, %v1829_v51  ;;  %v1219_v45 = vadd.f32 %v1218_v41, %v1217_v39  ;;  %v1267_v46 = vadd.f32 %v1266_v42, %v1265_v40 }
 0x16d   : > { %953 = vst [vmem:[%s1835_s24 + $0x30] sm:$0xff] %v921_v43  ;;  %969 = vst [vmem:[%s1835_s24 + $0xb0] sm:$0xff] %v937_v44  ;;  %v922_v47 = vadd.f32 %v1219_v45, %v1829_v51  ;;  %v938_v48 = vadd.f32 %v1267_v46, %v1829_v51 }
 0x16f   : > { %954 = vst [vmem:[%s1835_s24 + $0x38] sm:$0xff] %v922_v47  ;;  %970 = vst [vmem:[%s1835_s24 + $0xb8] sm:$0xff] %v938_v48  ;;  %v1220_v49 = vpop.f32.mrb[16].mxu0  ;;  %v1268_v50 = vpop.f32.mrb[16].mxu1 }
 0x170   : > { %v1221_v52 = vpop.f32.mrb[17].mxu0  ;;  %v1269_v53 = vpop.f32.mrb[17].mxu1 }
 0x171   : > { %v1222_v54 = vadd.f32 %v1221_v52, %v1220_v49  ;;  %v1270_v55 = vadd.f32 %v1269_v53, %v1268_v50  ;;  %v1223_v56 = vpop.f32.mrb[18].mxu0  ;;  %v1271_v57 = vpop.f32.mrb[18].mxu1 }
 0x172   : > { %v1224_v58 = vpop.f32.mrb[19].mxu0  ;;  %v1272_v59 = vpop.f32.mrb[19].mxu1 }
 0x173   : > { %v923_v60 = vadd.f32 %v1222_v54, %v1829_v51  ;;  %v939_v61 = vadd.f32 %v1270_v55, %v1829_v51  ;;  %v1225_v62 = vadd.f32 %v1224_v58, %v1223_v56  ;;  %v1273_v63 = vadd.f32 %v1272_v59, %v1271_v57 }
 0x175   : > { %955 = vst [vmem:[%s1835_s24 + $0x40] sm:$0xff] %v923_v60  ;;  %971 = vst [vmem:[%s1835_s24 + $0xc0] sm:$0xff] %v939_v61  ;;  %v924_v0 = vadd.f32 %v1225_v62, %v1829_v51  ;;  %v940_v1 = vadd.f32 %v1273_v63, %v1829_v51 }
 0x177   : > { %956 = vst [vmem:[%s1835_s24 + $0x48] sm:$0xff] %v924_v0  ;;  %972 = vst [vmem:[%s1835_s24 + $0xc8] sm:$0xff] %v940_v1  ;;  %v1226_v2 = vpop.f32.mrb[20].mxu0  ;;  %v1274_v3 = vpop.f32.mrb[20].mxu1 }
 0x178   : > { %v1227_v4 = vpop.f32.mrb[21].mxu0  ;;  %v1275_v5 = vpop.f32.mrb[21].mxu1 }
 0x179   : > { %v1228_v6 = vadd.f32 %v1227_v4, %v1226_v2  ;;  %v1276_v7 = vadd.f32 %v1275_v5, %v1274_v3  ;;  %v1229_v8 = vpop.f32.mrb[22].mxu0  ;;  %v1277_v9 = vpop.f32.mrb[22].mxu1 }
 0x17a   : > { %v1230_v10 = vpop.f32.mrb[23].mxu0  ;;  %v1278_v11 = vpop.f32.mrb[23].mxu1 }
 0x17b   : > { %v925_v12 = vadd.f32 %v1228_v6, %v1829_v51  ;;  %v941_v13 = vadd.f32 %v1276_v7, %v1829_v51  ;;  %v1231_v14 = vadd.f32 %v1230_v10, %v1229_v8  ;;  %v1279_v15 = vadd.f32 %v1278_v11, %v1277_v9 }
 0x17d   : > { %957 = vst [vmem:[%s1835_s24 + $0x50] sm:$0xff] %v925_v12  ;;  %973 = vst [vmem:[%s1835_s24 + $0xd0] sm:$0xff] %v941_v13  ;;  %v926_v16 = vadd.f32 %v1231_v14, %v1829_v51  ;;  %v942_v17 = vadd.f32 %v1279_v15, %v1829_v51 }
 0x17f   : > { %958 = vst [vmem:[%s1835_s24 + $0x58] sm:$0xff] %v926_v16  ;;  %974 = vst [vmem:[%s1835_s24 + $0xd8] sm:$0xff] %v942_v17  ;;  %v1232_v18 = vpop.f32.mrb[24].mxu0  ;;  %v1280_v19 = vpop.f32.mrb[24].mxu1 }
 0x180   : > { %v1233_v20 = vpop.f32.mrb[25].mxu0  ;;  %v1281_v21 = vpop.f32.mrb[25].mxu1 }
 0x181   : > { %v1234_v22 = vadd.f32 %v1233_v20, %v1232_v18  ;;  %v1282_v23 = vadd.f32 %v1281_v21, %v1280_v19  ;;  %v1235_v24 = vpop.f32.mrb[26].mxu0  ;;  %v1283_v25 = vpop.f32.mrb[26].mxu1 }
 0x182   : > { %v1236_v26 = vpop.f32.mrb[27].mxu0  ;;  %v1284_v27 = vpop.f32.mrb[27].mxu1 }
 0x183   : > { %v927_v28 = vadd.f32 %v1234_v22, %v1829_v51  ;;  %v943_v29 = vadd.f32 %v1282_v23, %v1829_v51  ;;  %v1237_v30 = vadd.f32 %v1236_v26, %v1235_v24  ;;  %v1285_v31 = vadd.f32 %v1284_v27, %v1283_v25 }
 0x185   : > { %959 = vst [vmem:[%s1835_s24 + $0x60] sm:$0xff] %v927_v28  ;;  %975 = vst [vmem:[%s1835_s24 + $0xe0] sm:$0xff] %v943_v29  ;;  %v928_v32 = vadd.f32 %v1237_v30, %v1829_v51  ;;  %v944_v33 = vadd.f32 %v1285_v31, %v1829_v51 }
 0x187   : > { %960 = vst [vmem:[%s1835_s24 + $0x68] sm:$0xff] %v928_v32  ;;  %976 = vst [vmem:[%s1835_s24 + $0xe8] sm:$0xff] %v944_v33  ;;  %v1238_v34 = vpop.f32.mrb[28].mxu0  ;;  %v1286_v35 = vpop.f32.mrb[28].mxu1 }
 0x188   : > { %v1239_v36 = vpop.f32.mrb[29].mxu0  ;;  %v1287_v37 = vpop.f32.mrb[29].mxu1 }
 0x189   : > { %v1240_v38 = vadd.f32 %v1239_v36, %v1238_v34  ;;  %v1288_v39 = vadd.f32 %v1287_v37, %v1286_v35  ;;  %v1241_v40 = vpop.f32.mrb[30].mxu0  ;;  %v1289_v41 = vpop.f32.mrb[30].mxu1 }
 0x18a   : > { %v1242_v42 = vpop.f32.mrb[31].mxu0  ;;  %v1290_v43 = vpop.f32.mrb[31].mxu1 }
 0x18b   : > { %v929_v44 = vadd.f32 %v1240_v38, %v1829_v51  ;;  %v945_v45 = vadd.f32 %v1288_v39, %v1829_v51  ;;  %v1243_v46 = vadd.f32 %v1242_v42, %v1241_v40  ;;  %v1291_v47 = vadd.f32 %v1290_v43, %v1289_v41 }
 0x18d   : > { %961 = vst [vmem:[%s1835_s24 + $0x70] sm:$0xff] %v929_v44  ;;  %977 = vst [vmem:[%s1835_s24 + $0xf0] sm:$0xff] %v945_v45  ;;  %v930_v48 = vadd.f32 %v1243_v46, %v1829_v51  ;;  %v946_v49 = vadd.f32 %v1291_v47, %v1829_v51 }
 0x18f   : > { %962 = vst [vmem:[%s1835_s24 + $0x78] sm:$0xff] %v930_v48  ;;  %978 = vst [vmem:[%s1835_s24 + $0xf8] sm:$0xff] %v946_v49 }
 0x190   : > { %1522 = shalt.err (!%p1519_p5)
}
 0x191   : > { %s1523_s25 = scalar_lea.hbm %s1898_s26, 4096  ;;  %s1527_s6 = scalar_lea.hbm %s1958_s3, 8192 }
 0x192   : > { %p1524_p9 = scmp.ne.s32.totalorder %s1898_s26, %s1523_s25  ;;  %p1528_p3 = scmp.lt.u32.totalorder %s1898_s26, %s1958_s3 }
 0x193   : > { %p1529_p7 = scmp.lt.u32.totalorder %s1527_s6, %s1523_s25  ;;  %p1531_p4 = scmp.lt.u32.totalorder %s1523_s25, %s1898_s26 }
 0x194   : > { %p1525_p1 = pnand %p1524_p9, %p1722_p10 }
 0x195   : > { %p1530_p13 = por %p1529_p7, %p1528_p3 }
 0x196   : > { %p1526_p2 = pneg %p1525_p1 }
 0x197   : > { %p1532_p6 = por %p1531_p4, %p1530_p13 }
 0x199   : > { %p1533_p8 = pnand %p1532_p6, %p1526_p2 }
 0x19b   : > { %1536 = shalt.err (!%p1533_p8)
}
 0x19c   : > { %s1604_s24 = smov 128   ;;  %s1605_s9 = smov 8  }
 0x19d   : > { %1314 = dma.vmem_to_hbm [thread:$0]  (%p1722_p10), %s1900_s10, 4096, %s1898_s26, %s980_s15, %s1604_s24, %s1604_s24, %s1605_s9  }
 0x19e PF: > { %s1009_s11 = sand.u32 1, %s1575_s12   ;;  %p1976_p12 = scmp.ne.s32.totalorder %s1966_s23, 0 }
 0x19f   : > { %p1977_p11 = scmp.ge.s32.totalorder %s1595_s17, 2  ;;  %s1010_s18 = scalar_lea.sflag [#allocation5], %s1009_s11 }
 0x1a1   : > { %p1325_p0 = pnand %p1977_p11, %p1976_p12 }
 0x1a3   : > { %1570 = dma.done.wait (!%p1325_p0), %s1010_s18, 4096  }
 0x1a4   : > { %1572 = vsyncadd (!%p1325_p0), %s1010_s18, 4294963200  ;;  %s20_s17 = sadd.s32 1, %s1595_s17   ;;  %s1978_s12 = smov %s1579_s13 }
 0x1a5   : > { %p17_p5 = scmp.ge.s32.totalorder %s20_s17, 4   ;;  %s1979_s13 = smov %s1583_s14 }
 0x1a6   : > { %s1980_s14 = smov %s1731_s5  ;;  %s1981_s15 = smov %s1591_s16 }
 0x1a7   : > { %s1982_s16 = smov %s1984_s28  ;;  %19 = sbr.rel (!%p17_p5) target bundleno = 7 (0x7), region = 93 }
 0x1ae   :  { %1015 = vsyncpa [#allocation4], 1 }
 0x1af   :  { %1017 = vsyncpa [#allocation4 + $0x1], 1 }
 0x1b0   :  { %1018 = vsyncpa [#allocation7], 1 }
 0x1b1   :  { %1019 = vsyncpa [#allocation5], 1 }
 0x1b2   :  { %1021 = vsyncpa [#allocation5 + $0x1], 1 }

</bundles_post_ra>
